<compile_context>
chip_gen: v6e
topology: v6e:2x2x1
jax: 0.10.0
libtpu: 0.0.40
codegen_flags: <defaults>
</compile_context>

<pallas_src>
import jax
import jax.numpy as jnp
from jax.experimental import pallas as pl
from jax.experimental.pallas import tpu as pltpu


def _conv1x1_kernel(x_ref, w_ref, b_ref, o_ref):
    # x_ref: (C_in, tp)    input pixels, channels on sublanes, pixels on lanes
    # w_ref: (C_out, C_in) weights
    # b_ref: (C_out, 1)    bias
    # o_ref: (C_out, tp)   output tile (lane-dense)
    x = x_ref[...]
    w = w_ref[...]
    c_in = x.shape[0]
    # VPU path: out[o, p] = b[o] + sum_k w[o, k] * x[k, p]  (f32 accumulation).
    # Bias is folded into the accumulator init (one fewer full-width add).
    acc = b_ref[...] + w[:, 0:1] * x[0:1, :]
    for k in range(1, c_in):
        acc = acc + w[:, k:k + 1] * x[k:k + 1, :]
    o_ref[...] = acc.astype(o_ref.dtype)


def conv1x1(x_nchw, weight, bias, *, tp=32768):
    """1x1 conv in NCHW. x: (N, C_in, H, W); weight: (C_out, C_in, 1, 1); bias: (C_out,)."""
    N, C_in, H, W = x_nchw.shape
    C_out = weight.shape[0]
    P = H * W

    # View as (N, C_in, pixels) -- contiguous reshape, no transpose.
    x = x_nchw.reshape(N, C_in, P)
    w_mat = weight.reshape(C_out, C_in)
    b_col = bias.reshape(C_out, 1)

    # Pixel tile: a multiple of 128, no larger than the (128-rounded) pixel count.
    p_rounded = pl.cdiv(P, 128) * 128
    tp_eff = min(tp, p_rounded)
    n_ptiles = pl.cdiv(P, tp_eff)
    P_pad = n_ptiles * tp_eff
    if P_pad != P:
        x = jnp.pad(x, ((0, 0), (0, 0), (0, P_pad - P)))

    itemsize = jnp.dtype(x.dtype).itemsize
    bytes_accessed = itemsize * (
        N * C_in * P_pad + N * C_out * P_pad + C_out * C_in + C_out
    )

    out = pl.pallas_call(
        _conv1x1_kernel,
        out_shape=jax.ShapeDtypeStruct((N, C_out, P_pad), x.dtype),
        grid_spec=pltpu.PrefetchScalarGridSpec(
            num_scalar_prefetch=0,
            grid=(N, n_ptiles),
            in_specs=[
                # Batch dim squeezed; pixels tiled on the lane axis.
                pl.BlockSpec((None, C_in, tp_eff), lambda n, p: (n, 0, p)),
                pl.BlockSpec((C_out, C_in), lambda n, p: (0, 0)),
                pl.BlockSpec((C_out, 1), lambda n, p: (0, 0)),
            ],
            out_specs=pl.BlockSpec((None, C_out, tp_eff), lambda n, p: (n, 0, p)),
        ),
        compiler_params=pltpu.CompilerParams(
            dimension_semantics=("parallel", "parallel"),
            vmem_limit_bytes=48 * 1024 * 1024,
        ),
        cost_estimate=pl.CostEstimate(
            flops=2 * N * P_pad * C_in * C_out,
            transcendentals=0,
            bytes_accessed=bytes_accessed,
        ),
    )(x, w_mat, b_col)

    if P_pad != P:
        out = out[:, :, :P]
    return out.reshape(N, C_out, H, W)


if __name__ == "__main__":
    key = jax.random.PRNGKey(0)
    k_x, k_w, k_b = jax.random.split(key, 3)

    # Conv2d(3, 19, kernel_size=1) parameter shapes, deterministic init.
    C_in, C_out = 3, 19
    weight = jax.random.normal(k_w, (C_out, C_in, 1, 1), dtype=jnp.float32) * 0.1
    bias = jax.random.normal(k_b, (C_out,), dtype=jnp.float32) * 0.1

    # Small NCHW input: batch=2, channels=3, spatial=16x16.
    x = jax.random.normal(k_x, (2, C_in, 16, 16), dtype=jnp.float32)

    out = conv1x1(x, weight, bias)
    jax.block_until_ready(out)

    # Correctness check against a plain-JAX reference of the 1x1 conv.
    ref = (
        jnp.einsum("nchw,oc->nohw", x, weight.reshape(C_out, C_in))
        + bias.reshape(1, C_out, 1, 1)
    )
    assert out.shape == (2, C_out, 16, 16)
    assert jnp.allclose(out, ref, atol=1e-5, rtol=1e-5)

    print("KERNEL_OK")
</pallas_src>

<mosaic_0001>
module attributes {stable_mosaic.version = 11 : i64} {
  func.func @_conv1x1_kernel(%arg0: i32, %arg1: i32, %arg2: memref<1x3x256xf32, #tpu.memory_space<vmem>>, %arg3: memref<19x3xf32, #tpu.memory_space<vmem>>, %arg4: memref<19x1xf32, #tpu.memory_space<vmem>>, %arg5: memref<1x19x256xf32, #tpu.memory_space<vmem>>) attributes {dimension_semantics = [#tpu.dimension_semantics<parallel>, #tpu.dimension_semantics<parallel>], iteration_bounds = array<i64: 2, 1>, scalar_prefetch = 0 : i64, scratch_operands = 0 : i64, tpu.core_type = #tpu.core_type<tc>, window_params = [{transform_indices = @transform_0, window_bounds = array<i64: 1, 3, 256>}, {pipeline_mode = #tpu.pipeline_mode<synchronous>, transform_indices = @transform_1, window_bounds = array<i64: 19, 3>}, {pipeline_mode = #tpu.pipeline_mode<synchronous>, transform_indices = @transform_2, window_bounds = array<i64: 19, 1>}, {transform_indices = @transform_3, window_bounds = array<i64: 1, 19, 256>}]} {
    %c0 = arith.constant 0 : index
    %c0_0 = arith.constant 0 : index
    %c0_1 = arith.constant 0 : index
    %0 = vector.load %arg2[%c0, %c0_0, %c0_1] : memref<1x3x256xf32, #tpu.memory_space<vmem>>, vector<1x3x256xf32>
    %1 = vector.shape_cast %0 : vector<1x3x256xf32> to vector<3x256xf32>
    %c0_2 = arith.constant 0 : index
    %c0_3 = arith.constant 0 : index
    %2 = vector.load %arg3[%c0_2, %c0_3] : memref<19x3xf32, #tpu.memory_space<vmem>>, vector<19x3xf32>
    %c0_4 = arith.constant 0 : index
    %c0_5 = arith.constant 0 : index
    %3 = vector.load %arg4[%c0_4, %c0_5] : memref<19x1xf32, #tpu.memory_space<vmem>>, vector<19x1xf32>
    %4 = vector.extract_strided_slice %2 {offsets = [0, 0], sizes = [19, 1], strides = [1, 1]} : vector<19x3xf32> to vector<19x1xf32>
    %5 = vector.extract_strided_slice %1 {offsets = [0, 0], sizes = [1, 256], strides = [1, 1]} : vector<3x256xf32> to vector<1x256xf32>
    %6 = vector.broadcast %4 : vector<19x1xf32> to vector<19x256xf32>
    %7 = vector.broadcast %5 : vector<1x256xf32> to vector<19x256xf32>
    %8 = arith.mulf %6, %7 : vector<19x256xf32>
    %9 = vector.broadcast %3 : vector<19x1xf32> to vector<19x256xf32>
    %10 = arith.addf %9, %8 : vector<19x256xf32>
    %11 = vector.extract_strided_slice %2 {offsets = [0, 1], sizes = [19, 1], strides = [1, 1]} : vector<19x3xf32> to vector<19x1xf32>
    %12 = vector.extract_strided_slice %1 {offsets = [1, 0], sizes = [1, 256], strides = [1, 1]} : vector<3x256xf32> to vector<1x256xf32>
    %13 = vector.broadcast %11 : vector<19x1xf32> to vector<19x256xf32>
    %14 = vector.broadcast %12 : vector<1x256xf32> to vector<19x256xf32>
    %15 = arith.mulf %13, %14 : vector<19x256xf32>
    %16 = arith.addf %10, %15 : vector<19x256xf32>
    %17 = vector.extract_strided_slice %2 {offsets = [0, 2], sizes = [19, 1], strides = [1, 1]} : vector<19x3xf32> to vector<19x1xf32>
    %18 = vector.extract_strided_slice %1 {offsets = [2, 0], sizes = [1, 256], strides = [1, 1]} : vector<3x256xf32> to vector<1x256xf32>
    %19 = vector.broadcast %17 : vector<19x1xf32> to vector<19x256xf32>
    %20 = vector.broadcast %18 : vector<1x256xf32> to vector<19x256xf32>
    %21 = arith.mulf %19, %20 : vector<19x256xf32>
    %22 = arith.addf %16, %21 : vector<19x256xf32>
    %c0_6 = arith.constant 0 : index
    %c0_7 = arith.constant 0 : index
    %c0_8 = arith.constant 0 : index
    %23 = vector.load %arg5[%c0_6, %c0_7, %c0_8] : memref<1x19x256xf32, #tpu.memory_space<vmem>>, vector<1x19x256xf32>
    %24 = vector.shape_cast %23 : vector<1x19x256xf32> to vector<19x256xf32>
    %25 = vector.shape_cast %22 : vector<19x256xf32> to vector<1x19x256xf32>
    tpu.vector_store %arg5[%c0_6, %c0_7, %c0_8], %25 {strides = array<i32>} : memref<1x19x256xf32, #tpu.memory_space<vmem>>, vector<1x19x256xf32>,
    return
  }
  func.func @transform_0(%arg0: i32, %arg1: i32) -> (i32, i32, i32) {
    %c0_i32 = arith.constant 0 : i32
    %c0_i32_0 = arith.constant 0 : i32
    return %arg0, %c0_i32, %arg1 : i32, i32, i32
  }
  func.func @transform_1(%arg0: i32, %arg1: i32) -> (i32, i32) {
    %c0_i32 = arith.constant 0 : i32
    %c0_i32_0 = arith.constant 0 : i32
    %c0_i32_1 = arith.constant 0 : i32
    return %c0_i32, %c0_i32_0 : i32, i32
  }
  func.func @transform_2(%arg0: i32, %arg1: i32) -> (i32, i32) {
    %c0_i32 = arith.constant 0 : i32
    %c0_i32_0 = arith.constant 0 : i32
    %c0_i32_1 = arith.constant 0 : i32
    return %c0_i32, %c0_i32_0 : i32, i32
  }
  func.func @transform_3(%arg0: i32, %arg1: i32) -> (i32, i32, i32) {
    %c0_i32 = arith.constant 0 : i32
    %c0_i32_0 = arith.constant 0 : i32
    return %arg0, %c0_i32, %arg1 : i32, i32, i32
  }
}

</mosaic_0001>

<bundles_post_ra>
// kernel: tpu_custom_call.1
= control target key start
LH: loop header
LB: loop body
LE: loop exit
PB: predicated region body
PF: predicated region fallthrough
CT: control target
= control target key end

     0   :  { %s547_s12 = smov 0   ;;  %s549_s13 = smov 0   ;;  %s606_s0 = inlined_call_operand.vmem [shape: f32[2,3,256], index: 0, kind: input, shape index: {}]   ;;  %s607_s1 = inlined_call_operand.vmem [shape: f32[19,3], index: 1, kind: input, shape index: {}]   ;;  %s608_s2 = inlined_call_operand.vmem [shape: f32[19,1], index: 2, kind: input, shape index: {}]   ;;  %s609_s3 = inlined_call_operand.vmem [shape: f32[2,19,256], index: 3, kind: output, shape index: {}]  }
   0x1   :  { %s551_s14 = smov 0  }
   0x2 LB: > { %s25_s15 = sadd.s32 1, %s518_s13  ;;  %p459_p0 = scmp.ge.s32.totalorder %s522_s14, 1  ;;  %s522_s14 = sphi %s551_s14, %s13_s14   ;;  %s518_s13 = sphi %s549_s13, %s611_s13   ;;  %s514_s12 = sphi %s547_s12, %s610_s12  }
   0x3   : > { %p27_p1 = scmp.ge.s32.totalorder %s25_s15, 2  ;;  %p158_p2 = scmp.lt.s32.totalorder %s522_s14, 3 }
   0x5   : > { %s613_s15 = smov (%p27_p1, %s25_s15), 0  ;;  %p159_p3 = pnand %p459_p0, %p158_p2 }
   0x6   : > { %p191_p4 = scmp.lt.s32.totalorder (!%p159_p3), %s514_s12, 1 }
   0x7   : > { %162 = sbr.rel (%p159_p3) target bundleno = 169 (0xa9), region = 32 }
   0xc   : > { %v213_v0 = vld [vmem:[%s607_s1 + $0x10] sm:$0x7]  ;;  %v211_v1 = vld [vmem:[%s607_s1] sm:$0xff]  ;;  %v524_v2 = vmov 0   ;;  %v212_v4 = vld [vmem:[%s607_s1 + $0x8] sm:$0xff]  ;;  %v525_v7 = vmov 1   ;;  %v233_v9 = vlaneseq }
   0xd   : > { %495 = vset.pattern.permute.xlu1 %v524_v2  ;;  %494 = vset.pattern.permute.xlu0 %v524_v2  ;;  %v214_v3 = vld [vmem:[%s608_s2] sm:$0xff]  ;;  %v216_v5 = vld [vmem:[%s608_s2 + $0x10] sm:$0x7]  ;;  %v215_v6 = vld [vmem:[%s608_s2 + $0x8] sm:$0xff]  ;;  %v526_v8 = vmov 2   ;;  %s615_s12 = smov (!%p191_p4, %s514_s12), 1 }
   0xe   : > { %229 = vperm.xlu1 %495, %v213_v0   ;;  %219 = vperm.xlu0 %494, %v211_v1   ;;  %s465_s28 = sshll.u32 %s615_s12, 3  ;;  %v234_v10 = vshrl.u32 %v233_v9, 7  ;;  %s466_s5 = smul.u32 48, %s615_s12 }
   0xf   : > { %s198_s4 = scalar_lea.vmem %s606_s0, %s465_s28 }
  0x10   : > { %v235_v13 = vsub.s32 0, %v234_v10  ;;  %v239_v14 = vsub.s32 4, %v234_v10  ;;  %v210_v15 = vld [vmem:[%s198_s4] sm:$0x77]  ;;  %v292_v16 = vsub.s32 1, %v234_v10  ;;  %v296_v17 = vsub.s32 5, %v234_v10  ;;  %s208_s8 = scalar_lea.vmem %s609_s3, %s466_s5 }
  0x11   : > { %v334_v24 = vsub.s32 2, %v234_v10  ;;  %v338_v25 = vsub.s32 6, %v234_v10 }
  0x12   : > { %259 = vperm.xlu1 %495, %v214_v3   ;;  %224 = vperm.xlu0 %494, %v212_v4   ;;  %v236_v20 = vrot.slane %v210_v15, %v235_v13  ;;  %v240_v21 = vrot.slane %v210_v15, %v239_v14  ;;  %v293_v22 = vrot.slane %v210_v15, %v292_v16 }
  0x13   : > { %v297_v23 = vrot.slane %v210_v15, %v296_v17  ;;  %v335_v32 = vrot.slane %v210_v15, %v334_v24  ;;  %v339_v33 = vrot.slane %v210_v15, %v338_v25 }
  0x14   : > { %v246_v28 = vrot.slane %v236_v20, %v235_v13  ;;  %v250_v29 = vrot.slane %v240_v21, %v235_v13  ;;  %v303_v30 = vrot.slane %v293_v22, %v292_v16 }
  0x15   : > { %v307_v31 = vrot.slane %v297_v23, %v292_v16  ;;  %v345_v40 = vrot.slane %v335_v32, %v334_v24  ;;  %v349_v41 = vrot.slane %v339_v33, %v334_v24 }
  0x16   : > { %269 = vperm.xlu1 %495, %v216_v5   ;;  %264 = vperm.xlu0 %494, %v215_v6  }
  0x1a   : > { %497 = vset.pattern.permute.xlu1 %v525_v7  ;;  %496 = vset.pattern.permute.xlu0 %v525_v7 }
  0x1b   : > { %283 = vperm.xlu1 %497, %v212_v4   ;;  %279 = vperm.xlu0 %496, %v211_v1  }
  0x1f   : > { %287 = vperm.xlu1 %497, %v213_v0   ;;  %498 = vset.pattern.permute.xlu0 %v526_v8 }
  0x20   : > { %321 = vperm.xlu0 %498, %v211_v1  }
  0x23   : > { %499 = vset.pattern.permute.xlu1 %v526_v8 }
  0x24   : > { %325 = vperm.xlu1 %499, %v212_v4  }
  0x28   : > { %329 = vperm.xlu1 %499, %v213_v0  }
  0x89   : > { %v230_v11 = vpop.permute.xlu1 %229  ;;  %v220_v12 = vpop.permute.xlu0 %219 }
  0x8a   : > { %v251_v34 = vmul.f32 %v246_v28, %v220_v12  ;;  %v252_v35 = vmul.f32 %v250_v29, %v220_v12  ;;  %v255_v58 = vmul.f32 %v246_v28, %v230_v11  ;;  %v256_v59 = vmul.f32 %v250_v29, %v230_v11 }
  0x8d   : > { %v260_v18 = vpop.permute.xlu1 %259  ;;  %v225_v19 = vpop.permute.xlu0 %224 }
  0x8e   : > { %v253_v42 = vmul.f32 %v246_v28, %v225_v19  ;;  %v254_v43 = vmul.f32 %v250_v29, %v225_v19  ;;  %v272_v44 = vadd.f32 %v260_v18, %v251_v34  ;;  %v273_v45 = vadd.f32 %v260_v18, %v252_v35 }
  0x91   : > { %v270_v26 = vpop.permute.xlu1 %269  ;;  %v265_v27 = vpop.permute.xlu0 %264 }
  0x92   : > { %v274_v54 = vadd.f32 %v265_v27, %v253_v42  ;;  %v275_v55 = vadd.f32 %v265_v27, %v254_v43  ;;  %v276_v3 = vadd.f32 %v270_v26, %v255_v58  ;;  %v277_v4 = vadd.f32 %v270_v26, %v256_v59 }
  0x96   : > { %v284_v36 = vpop.permute.xlu1 %283  ;;  %v280_v37 = vpop.permute.xlu0 %279 }
  0x97   : > { %v308_v38 = vmul.f32 %v303_v30, %v280_v37  ;;  %v309_v39 = vmul.f32 %v307_v31, %v280_v37  ;;  %v310_v47 = vmul.f32 %v303_v30, %v284_v36  ;;  %v311_v48 = vmul.f32 %v307_v31, %v284_v36 }
  0x99   : > { %v314_v50 = vadd.f32 %v308_v38, %v272_v44  ;;  %v315_v51 = vadd.f32 %v309_v39, %v273_v45  ;;  %v316_v60 = vadd.f32 %v310_v47, %v274_v54  ;;  %v317_v61 = vadd.f32 %v311_v48, %v275_v55 }
  0x9a   : > { %v288_v46 = vpop.permute.xlu1 %287 }
  0x9b   : > { %v322_v49 = vpop.permute.xlu0 %321  ;;  %v312_v63 = vmul.f32 %v303_v30, %v288_v46  ;;  %v313_v0 = vmul.f32 %v307_v31, %v288_v46 }
  0x9c   : > { %v350_v52 = vmul.f32 %v345_v40, %v322_v49  ;;  %v351_v53 = vmul.f32 %v349_v41, %v322_v49 }
  0x9d   : > { %v318_v8 = vadd.f32 %v312_v63, %v276_v3  ;;  %v319_v9 = vadd.f32 %v313_v0, %v277_v4 }
  0x9e   : > { %v356_v56 = vadd.f32 %v350_v52, %v314_v50  ;;  %v357_v57 = vadd.f32 %v351_v53, %v315_v51 }
  0x9f   : > { %v326_v62 = vpop.permute.xlu1 %325 }
  0xa0   : > { %362 = vst [vmem:[%s208_s8] sm:$0xff] %v356_v56  ;;  %363 = vst [vmem:[%s208_s8 + $0x8] sm:$0xff] %v357_v57  ;;  %v352_v1 = vmul.f32 %v345_v40, %v326_v62  ;;  %v353_v2 = vmul.f32 %v349_v41, %v326_v62 }
  0xa2   : > { %v358_v5 = vadd.f32 %v352_v1, %v316_v60  ;;  %v359_v6 = vadd.f32 %v353_v2, %v317_v61 }
  0xa3   : > { %v330_v7 = vpop.permute.xlu1 %329 }
  0xa4   : > { %364 = vst [vmem:[%s208_s8 + $0x10] sm:$0xff] %v358_v5  ;;  %365 = vst [vmem:[%s208_s8 + $0x18] sm:$0xff] %v359_v6  ;;  %v354_v10 = vmul.f32 %v345_v40, %v330_v7  ;;  %v355_v11 = vmul.f32 %v349_v41, %v330_v7 }
  0xa6   : > { %v360_v12 = vadd.f32 %v354_v10, %v318_v8  ;;  %v361_v13 = vadd.f32 %v355_v11, %v319_v9 }
  0xa8   : > { %366 = vst [vmem:[%s208_s8 + $0x20] sm:$0x7] %v360_v12  ;;  %367 = vst [vmem:[%s208_s8 + $0x28] sm:$0x7] %v361_v13 }
  0xa9 PF: > { %s13_s14 = sadd.s32 1, %s522_s14   ;;  %s610_s12 = smov %s518_s13 }
  0xaa   : > { %p10_p5 = scmp.ge.s32.totalorder %s13_s14, 4   ;;  %s611_s13 = smov %s613_s15 }
  0xac   :  { %12 = sbr.rel (!%p10_p5) target bundleno = 2 (0x2), region = 62 }

</bundles_post_ra>
